<compile_context>
chip_gen: v6e
topology: v6e:2x2x1
jax: 0.10.0
libtpu: 0.0.40
codegen_flags: <defaults>
</compile_context>

<pallas_src>
import functools

import jax
import jax.numpy as jnp
from jax import lax
from jax.experimental import pallas as pl
from jax.experimental.pallas import tpu as pltpu


def _round_up(x, m):
    return (x + m - 1) // m * m


def _attention_kernel(q_ref, ctx_ref, w_in_ref, b_in_ref, w_mix_ref, w_q_ref,
                      b_out_ref, out_ref, weights_ref, *, lq_valid):
    # q_ref:     (TB, Lo_blk, Dp)   input dtype
    # ctx_ref:   (TB, Lqp,    Dp)   input dtype
    # w_in_ref:  (Dp, Dp)           pre-transposed:  x @ w_in_ref == linear_in(x)
    # b_in_ref:  (1, Dp)            f32
    # w_mix_ref: (Dp, Op)           rows of linear_out acting on `mix`
    # w_q_ref:   (Dp, Op)           rows of linear_out acting on `q'`
    # b_out_ref: (1, Op)            f32
    q = q_ref[...]                       # native dtype (bf16 stays bf16 on the MXU)
    ctx = ctx_ref[...]
    lqp = ctx_ref.shape[1]

    # linear_in: shared weights -> fold (TB, Lo) into the M dimension of one matmul.
    q_proj = lax.dot_general(
        q, w_in_ref[...],
        dimension_numbers=(((2,), (0,)), ((), ())),
        preferred_element_type=jnp.float32)
    q_proj = q_proj + b_in_ref[...][None]          # (TB, Lo, Dp) f32
    qp = q_proj.astype(q.dtype)                    # operand dtype for later matmuls

    # scores = q' @ ctx^T, expressed with contracting dims (no explicit transpose).
    scores = lax.dot_general(
        qp, ctx,
        dimension_numbers=(((2,), (2,)), ((0,), (0,))),
        preferred_element_type=jnp.float32)        # (TB, Lo, Lqp) f32

    # Mask the zero-padded context columns before the softmax.
    if lq_valid < lqp:
        col = lax.broadcasted_iota(jnp.int32, scores.shape, 2)
        scores = jnp.where(col < lq_valid, scores, jnp.float32(-1e30))

    # Numerically-stable softmax; divide replaced by EUP reciprocal + vmul.
    m = jnp.max(scores, axis=-1, keepdims=True)
    e = jnp.exp(scores - m)
    denom = jnp.sum(e, axis=-1, keepdims=True)
    inv = pl.reciprocal(denom, approx=True)
    inv = inv * (2.0 - denom * inv)                # one Newton step -> full f32 accuracy
    weights = e * inv                              # (TB, Lo, Lqp) f32
    weights_ref[...] = weights.astype(weights_ref.dtype)

    # mix = weights @ ctx  (batched, contraction over Lq).
    mix = lax.dot_general(
        weights.astype(ctx.dtype), ctx,
        dimension_numbers=(((2,), (1,)), ((0,), (0,))),
        preferred_element_type=jnp.float32)        # (TB, Lo, Dp)

    # linear_out without the concat: cat([mix, q']) @ W_out == mix @ W_mix + q' @ W_q.
    out = lax.dot_general(
        mix.astype(q.dtype), w_mix_ref[...],
        dimension_numbers=(((2,), (0,)), ((), ())),
        preferred_element_type=jnp.float32)
    out = out + lax.dot_general(
        qp, w_q_ref[...],
        dimension_numbers=(((2,), (0,)), ((), ())),
        preferred_element_type=jnp.float32)
    out = jnp.tanh(out + b_out_ref[...][None])
    out_ref[...] = out.astype(out_ref.dtype)


def attention_general(query, context, w_in, b_in, w_out, b_out,
                      *, batch_block=8, lout_block=256):
    """query: [B, Lout, D], context: [B, Lq, D].
    w_in: [D, D]  (PyTorch out x in layout), b_in: [D]
    w_out: [outdim, 2D],                     b_out: [outdim]
    Returns (output [B, Lout, outdim], weights [B, Lout, Lq])."""
    B, Lout, D = query.shape
    Lq = context.shape[1]
    outdim = w_out.shape[0]
    dtype = query.dtype

    # Lane dims padded to 128 (lane-dense MXU operands / unmasked stores);
    # Lout padded to a multiple of the sublane-aligned Lout block; batch padded
    # to a multiple of the batch block so the grid divides evenly.
    Dp = _round_up(D, 128)
    Op = _round_up(outdim, 128)
    Lqp = _round_up(Lq, 128)
    TB = min(batch_block, B)
    Bp = _round_up(B, TB)
    Lo_blk = min(_round_up(Lout, 8), lout_block)
    Lop = _round_up(Lout, Lo_blk)

    # --- parameter prep (in real use, do this once at parameter-load time, not per call) ---
    w_in_t = jnp.zeros((Dp, Dp), dtype).at[:D, :D].set(jnp.transpose(w_in).astype(dtype))
    b_in_p = jnp.zeros((1, Dp), jnp.float32).at[:, :D].set(b_in.astype(jnp.float32))
    # Split linear_out so the kernel never concatenates along the lane axis.
    w_mix = jnp.zeros((Dp, Op), dtype).at[:D, :outdim].set(
        jnp.transpose(w_out[:, :D]).astype(dtype))
    w_q = jnp.zeros((Dp, Op), dtype).at[:D, :outdim].set(
        jnp.transpose(w_out[:, D:]).astype(dtype))
    b_out_p = jnp.zeros((1, Op), jnp.float32).at[:, :outdim].set(b_out.astype(jnp.float32))

    # --- zero-padded inputs (padding is exact-neutral: see masking in the kernel) ---
    q_p = jnp.zeros((Bp, Lop, Dp), dtype).at[:B, :Lout, :D].set(query)
    c_p = jnp.zeros((Bp, Lqp, Dp), dtype).at[:B, :Lq, :D].set(context)

    grid = (Bp // TB, Lop // Lo_blk)

    # Size the scoped VMEM budget from the real block working set (double-buffered).
    isz = jnp.dtype(dtype).itemsize
    blk_bytes = (TB * Lo_blk * Dp + TB * Lqp * Dp
                 + TB * Lo_blk * Op + TB * Lo_blk * Lqp) * isz
    param_bytes = (Dp * Dp + 2 * Dp * Op) * isz + (Dp + Op) * 4
    vmem_limit = int(min(max(4 * blk_bytes + 2 * param_bytes, 32 * 2**20), 64 * 2**20))
    # TODO(synk): for very large Lq, add a reduction grid axis over Lq with an
    # online-softmax accumulator instead of holding the full (Lo_blk, Lq) scores tile.

    out_shapes = (
        jax.ShapeDtypeStruct((Bp, Lop, Op), dtype),
        jax.ShapeDtypeStruct((Bp, Lop, Lqp), dtype),   # weights in input dtype
    )

    f = pl.pallas_call(
        functools.partial(_attention_kernel, lq_valid=Lq),
        out_shape=out_shapes,
        grid_spec=pltpu.PrefetchScalarGridSpec(
            num_scalar_prefetch=0,
            grid=grid,
            in_specs=[
                pl.BlockSpec((TB, Lo_blk, Dp), lambda b, o: (b, o, 0)),   # query
                pl.BlockSpec((TB, Lqp, Dp), lambda b, o: (b, 0, 0)),      # context
                pl.BlockSpec((Dp, Dp), lambda b, o: (0, 0)),              # w_in^T
                pl.BlockSpec((1, Dp), lambda b, o: (0, 0)),               # b_in
                pl.BlockSpec((Dp, Op), lambda b, o: (0, 0)),              # w_mix
                pl.BlockSpec((Dp, Op), lambda b, o: (0, 0)),              # w_q
                pl.BlockSpec((1, Op), lambda b, o: (0, 0)),               # b_out
            ],
            out_specs=[
                pl.BlockSpec((TB, Lo_blk, Op), lambda b, o: (b, o, 0)),   # output
                pl.BlockSpec((TB, Lo_blk, Lqp), lambda b, o: (b, o, 0)),  # weights
            ],
        ),
        compiler_params=pltpu.CompilerParams(
            dimension_semantics=("parallel", "parallel"),
            vmem_limit_bytes=vmem_limit),
    )
    out_p, weights_p = f(q_p, c_p, w_in_t, b_in_p, w_mix, w_q, b_out_p)
    return out_p[:B, :Lout, :outdim], weights_p[:B, :Lout, :Lq]


def _reference(query, context, w_in, b_in, w_out, b_out):
    # Pure-JAX reference mirroring the PyTorch forward (attention_type='general').
    B, Lout, D = query.shape
    q = query.reshape(B * Lout, D) @ w_in.T + b_in
    q = q.reshape(B, Lout, D)
    scores = jnp.einsum('bod,bqd->boq', q, context)
    weights = jax.nn.softmax(scores, axis=-1)
    mix = jnp.einsum('boq,bqd->bod', weights, context)
    combined = jnp.concatenate([mix, q], axis=-1)
    out = jnp.tanh(combined.reshape(B * Lout, 2 * D) @ w_out.T + b_out)
    return out.reshape(B, Lout, -1), weights


def _run_case(key, B, Lout, Lq, D, outdim):
    k1, k2, k3, k4, k5, k6 = jax.random.split(key, 6)
    query = jax.random.normal(k1, (B, Lout, D), dtype=jnp.float32)
    context = jax.random.normal(k2, (B, Lq, D), dtype=jnp.float32)
    w_in = jax.random.normal(k3, (D, D), dtype=jnp.float32) * 0.1
    b_in = jax.random.normal(k4, (D,), dtype=jnp.float32) * 0.1
    w_out = jax.random.normal(k5, (outdim, 2 * D), dtype=jnp.float32) * 0.1
    b_out = jax.random.normal(k6, (outdim,), dtype=jnp.float32) * 0.1

    out, weights = attention_general(query, context, w_in, b_in, w_out, b_out)
    out = jax.block_until_ready(out)
    weights = jax.block_until_ready(weights)

    ref_out, ref_w = _reference(query, context, w_in, b_in, w_out, b_out)
    assert out.shape == (B, Lout, outdim)
    assert weights.shape == (B, Lout, Lq)
    assert jnp.allclose(out, ref_out, atol=1e-4, rtol=1e-4)
    assert jnp.allclose(weights, ref_w, atol=1e-4, rtol=1e-4)


if __name__ == "__main__":
    key = jax.random.PRNGKey(0)
    k_a, k_b = jax.random.split(key)
    # Canonical small case matching the module docstring style.
    _run_case(k_a, B=2, Lout=1, Lq=8, D=32, outdim=32)
    # Exercises batch / Lout / Lq / D / outdim padding and masking paths.
    _run_case(k_b, B=3, Lout=5, Lq=20, D=48, outdim=40)
    print("KERNEL_OK")
</pallas_src>

<mosaic_0001>
module attributes {stable_mosaic.version = 11 : i64} {
  func.func @_attention_kernel(%arg0: i32, %arg1: i32, %arg2: memref<2x8x128xf32, #tpu.memory_space<vmem>>, %arg3: memref<2x128x128xf32, #tpu.memory_space<vmem>>, %arg4: memref<128x128xf32, #tpu.memory_space<vmem>>, %arg5: memref<1x128xf32, #tpu.memory_space<vmem>>, %arg6: memref<128x128xf32, #tpu.memory_space<vmem>>, %arg7: memref<128x128xf32, #tpu.memory_space<vmem>>, %arg8: memref<1x128xf32, #tpu.memory_space<vmem>>, %arg9: memref<2x8x128xf32, #tpu.memory_space<vmem>>, %arg10: memref<2x8x128xf32, #tpu.memory_space<vmem>>) attributes {dimension_semantics = [#tpu.dimension_semantics<parallel>, #tpu.dimension_semantics<parallel>], iteration_bounds = array<i64: 1, 1>, scalar_prefetch = 0 : i64, scratch_operands = 0 : i64, tpu.core_type = #tpu.core_type<tc>, window_params = [{transform_indices = @transform_0, window_bounds = array<i64: 2, 8, 128>}, {transform_indices = @transform_1, window_bounds = array<i64: 2, 128, 128>}, {pipeline_mode = #tpu.pipeline_mode<synchronous>, transform_indices = @transform_2, window_bounds = array<i64: 128, 128>}, {pipeline_mode = #tpu.pipeline_mode<synchronous>, transform_indices = @transform_3, window_bounds = array<i64: 1, 128>}, {pipeline_mode = #tpu.pipeline_mode<synchronous>, transform_indices = @transform_4, window_bounds = array<i64: 128, 128>}, {pipeline_mode = #tpu.pipeline_mode<synchronous>, transform_indices = @transform_5, window_bounds = array<i64: 128, 128>}, {pipeline_mode = #tpu.pipeline_mode<synchronous>, transform_indices = @transform_6, window_bounds = array<i64: 1, 128>}, {transform_indices = @transform_7, window_bounds = array<i64: 2, 8, 128>}, {transform_indices = @transform_8, window_bounds = array<i64: 2, 8, 128>}]} {
    %c0 = arith.constant 0 : index
    %c0_0 = arith.constant 0 : index
    %c0_1 = arith.constant 0 : index
    %0 = vector.load %arg2[%c0, %c0_0, %c0_1] : memref<2x8x128xf32, #tpu.memory_space<vmem>>, vector<2x8x128xf32>
    %c0_2 = arith.constant 0 : index
    %c0_3 = arith.constant 0 : index
    %c0_4 = arith.constant 0 : index
    %1 = vector.load %arg3[%c0_2, %c0_3, %c0_4] : memref<2x128x128xf32, #tpu.memory_space<vmem>>, vector<2x128x128xf32>
    %c0_5 = arith.constant 0 : index
    %c0_6 = arith.constant 0 : index
    %2 = vector.load %arg4[%c0_5, %c0_6] : memref<128x128xf32, #tpu.memory_space<vmem>>, vector<128x128xf32>
    %cst = arith.constant dense<0.000000e+00> : vector<2x8x128xf32>
    %3 = tpu.matmul %0, %2, %cst {dimension_numbers = #tpu.dot_dimension_numbers<[2], [0], [0, 1], [1], [0, 0, 0, 1, 1, 1], [], []>} : vector<2x8x128xf32>, vector<128x128xf32>, vector<2x8x128xf32> -> vector<2x8x128xf32>
    %c0_7 = arith.constant 0 : index
    %c0_8 = arith.constant 0 : index
    %4 = vector.load %arg5[%c0_7, %c0_8] : memref<1x128xf32, #tpu.memory_space<vmem>>, vector<1x128xf32>
    %5 = vector.shape_cast %4 : vector<1x128xf32> to vector<1x1x128xf32>
    %6 = vector.broadcast %5 : vector<1x1x128xf32> to vector<2x8x128xf32>
    %7 = arith.addf %3, %6 : vector<2x8x128xf32>
    %cst_9 = arith.constant dense<0.000000e+00> : vector<2x8x128xf32>
    %8 = tpu.matmul %7, %1, %cst_9 {dimension_numbers = #tpu.dot_dimension_numbers<[2], [2], [1], [1], [0, 0, 0, 1, 1, 1], [0], [0]>} : vector<2x8x128xf32>, vector<2x128x128xf32>, vector<2x8x128xf32> -> vector<2x8x128xf32>
    %9 = tpu.iota {dimensions = array<i32: 2>} : vector<2x8x128xi32>
    %c8_i32 = arith.constant 8 : i32
    %10 = vector.broadcast %c8_i32 : i32 to vector<2x8x128xi32>
    %11 = arith.cmpi slt, %9, %10 : vector<2x8x128xi32>
    %cst_10 = arith.constant -1.000000e+30 : f32
    %12 = vector.broadcast %cst_10 : f32 to vector<2x8x128xf32>
    %13 = arith.select %11, %8, %12 : vector<2x8x128xi1>, vector<2x8x128xf32>
    %cst_11 = arith.constant dense<0xFF800000> : vector<2x8xf32>
    %14 = vector.multi_reduction <maximumf>, %13, %cst_11 [2] : vector<2x8x128xf32> to vector<2x8xf32>
    %15 = vector.shape_cast %14 : vector<2x8xf32> to vector<2x8x1xf32>
    %16 = vector.broadcast %15 : vector<2x8x1xf32> to vector<2x8x128xf32>
    %17 = arith.subf %13, %16 : vector<2x8x128xf32>
    %18 = math.exp %17 : vector<2x8x128xf32>
    %cst_12 = arith.constant dense<0.000000e+00> : vector<2x8xf32>
    %19 = vector.multi_reduction <add>, %18, %cst_12 [2] : vector<2x8x128xf32> to vector<2x8xf32>
    %20 = vector.shape_cast %19 : vector<2x8xf32> to vector<2x8x1xf32>
    %21 = tpu.reciprocal %20 {approx = true} : vector<2x8x1xf32> -> vector<2x8x1xf32>
    %22 = arith.mulf %20, %21 : vector<2x8x1xf32>
    %cst_13 = arith.constant 2.000000e+00 : f32
    %23 = vector.broadcast %cst_13 : f32 to vector<2x8x1xf32>
    %24 = arith.subf %23, %22 : vector<2x8x1xf32>
    %25 = arith.mulf %21, %24 : vector<2x8x1xf32>
    %26 = vector.broadcast %25 : vector<2x8x1xf32> to vector<2x8x128xf32>
    %27 = arith.mulf %18, %26 : vector<2x8x128xf32>
    %c0_14 = arith.constant 0 : index
    %c0_15 = arith.constant 0 : index
    %c0_16 = arith.constant 0 : index
    %28 = vector.load %arg10[%c0_14, %c0_15, %c0_16] : memref<2x8x128xf32, #tpu.memory_space<vmem>>, vector<2x8x128xf32>
    tpu.vector_store %arg10[%c0_14, %c0_15, %c0_16], %27 {strides = array<i32>} : memref<2x8x128xf32, #tpu.memory_space<vmem>>, vector<2x8x128xf32>,
    %cst_17 = arith.constant dense<0.000000e+00> : vector<2x8x128xf32>
    %29 = tpu.matmul %27, %1, %cst_17 {dimension_numbers = #tpu.dot_dimension_numbers<[2], [1], [1], [2], [0, 0, 0, 1, 1, 2], [0], [0]>} : vector<2x8x128xf32>, vector<2x128x128xf32>, vector<2x8x128xf32> -> vector<2x8x128xf32>
    %c0_18 = arith.constant 0 : index
    %c0_19 = arith.constant 0 : index
    %30 = vector.load %arg6[%c0_18, %c0_19] : memref<128x128xf32, #tpu.memory_space<vmem>>, vector<128x128xf32>
    %cst_20 = arith.constant dense<0.000000e+00> : vector<2x8x128xf32>
    %31 = tpu.matmul %29, %30, %cst_20 {dimension_numbers = #tpu.dot_dimension_numbers<[2], [0], [0, 1], [1], [0, 0, 0, 1, 1, 1], [], []>} : vector<2x8x128xf32>, vector<128x128xf32>, vector<2x8x128xf32> -> vector<2x8x128xf32>
    %c0_21 = arith.constant 0 : index
    %c0_22 = arith.constant 0 : index
    %32 = vector.load %arg7[%c0_21, %c0_22] : memref<128x128xf32, #tpu.memory_space<vmem>>, vector<128x128xf32>
    %cst_23 = arith.constant dense<0.000000e+00> : vector<2x8x128xf32>
    %33 = tpu.matmul %7, %32, %cst_23 {dimension_numbers = #tpu.dot_dimension_numbers<[2], [0], [0, 1], [1], [0, 0, 0, 1, 1, 1], [], []>} : vector<2x8x128xf32>, vector<128x128xf32>, vector<2x8x128xf32> -> vector<2x8x128xf32>
    %34 = arith.addf %31, %33 : vector<2x8x128xf32>
    %c0_24 = arith.constant 0 : index
    %c0_25 = arith.constant 0 : index
    %35 = vector.load %arg8[%c0_24, %c0_25] : memref<1x128xf32, #tpu.memory_space<vmem>>, vector<1x128xf32>
    %36 = vector.shape_cast %35 : vector<1x128xf32> to vector<1x1x128xf32>
    %37 = vector.broadcast %36 : vector<1x1x128xf32> to vector<2x8x128xf32>
    %38 = arith.addf %34, %37 : vector<2x8x128xf32>
    %39 = math.tanh %38 : vector<2x8x128xf32>
    %c0_26 = arith.constant 0 : index
    %c0_27 = arith.constant 0 : index
    %c0_28 = arith.constant 0 : index
    %40 = vector.load %arg9[%c0_26, %c0_27, %c0_28] : memref<2x8x128xf32, #tpu.memory_space<vmem>>, vector<2x8x128xf32>
    tpu.vector_store %arg9[%c0_26, %c0_27, %c0_28], %39 {strides = array<i32>} : memref<2x8x128xf32, #tpu.memory_space<vmem>>, vector<2x8x128xf32>,
    return
  }
  func.func @transform_0(%arg0: i32, %arg1: i32) -> (i32, i32, i32) {
    %c0_i32 = arith.constant 0 : i32
    %c0_i32_0 = arith.constant 0 : i32
    return %arg0, %arg1, %c0_i32 : i32, i32, i32
  }
  func.func @transform_1(%arg0: i32, %arg1: i32) -> (i32, i32, i32) {
    %c0_i32 = arith.constant 0 : i32
    %c0_i32_0 = arith.constant 0 : i32
    %c0_i32_1 = arith.constant 0 : i32
    return %arg0, %c0_i32, %c0_i32_0 : i32, i32, i32
  }
  func.func @transform_2(%arg0: i32, %arg1: i32) -> (i32, i32) {
    %c0_i32 = arith.constant 0 : i32
    %c0_i32_0 = arith.constant 0 : i32
    %c0_i32_1 = arith.constant 0 : i32
    return %c0_i32, %c0_i32_0 : i32, i32
  }
  func.func @transform_3(%arg0: i32, %arg1: i32) -> (i32, i32) {
    %c0_i32 = arith.constant 0 : i32
    %c0_i32_0 = arith.constant 0 : i32
    %c0_i32_1 = arith.constant 0 : i32
    return %c0_i32, %c0_i32_0 : i32, i32
  }
  func.func @transform_4(%arg0: i32, %arg1: i32) -> (i32, i32) {
    %c0_i32 = arith.constant 0 : i32
    %c0_i32_0 = arith.constant 0 : i32
    %c0_i32_1 = arith.constant 0 : i32
    return %c0_i32, %c0_i32_0 : i32, i32
  }
  func.func @transform_5(%arg0: i32, %arg1: i32) -> (i32, i32) {
    %c0_i32 = arith.constant 0 : i32
    %c0_i32_0 = arith.constant 0 : i32
    %c0_i32_1 = arith.constant 0 : i32
    return %c0_i32, %c0_i32_0 : i32, i32
  }
  func.func @transform_6(%arg0: i32, %arg1: i32) -> (i32, i32) {
    %c0_i32 = arith.constant 0 : i32
    %c0_i32_0 = arith.constant 0 : i32
    %c0_i32_1 = arith.constant 0 : i32
    return %c0_i32, %c0_i32_0 : i32, i32
  }
  func.func @transform_7(%arg0: i32, %arg1: i32) -> (i32, i32, i32) {
    %c0_i32 = arith.constant 0 : i32
    %c0_i32_0 = arith.constant 0 : i32
    return %arg0, %arg1, %c0_i32 : i32, i32, i32
  }
  func.func @transform_8(%arg0: i32, %arg1: i32) -> (i32, i32, i32) {
    %c0_i32 = arith.constant 0 : i32
    %c0_i32_0 = arith.constant 0 : i32
    return %arg0, %arg1, %c0_i32 : i32, i32, i32
  }
}

</mosaic_0001>

<bundles_post_ra>
// kernel: tpu_custom_call.1
= control target key start
LH: loop header
LB: loop body
LE: loop exit
PB: predicated region body
PF: predicated region fallthrough
CT: control target
= control target key end

     0   :  { %14 = vsyncpa [#allocation3], 0  ;;  %s1625_s0 = inlined_call_operand.hbm [shape: f32[2,8,128], index: 0, kind: input, shape index: {}]   ;;  %s1626_s1 = inlined_call_operand.hbm [shape: f32[2,128,128], index: 1, kind: input, shape index: {}]   ;;  %s1627_s2 = inlined_call_operand.hbm [shape: f32[128,128], index: 2, kind: input, shape index: {}]   ;;  %s1628_s3 = inlined_call_operand.vmem [shape: f32[1,128], index: 3, kind: input, shape index: {}]   ;;  %s1629_s4 = inlined_call_operand.hbm [shape: f32[128,128], index: 4, kind: input, shape index: {}]   ;;  %s1630_s5 = inlined_call_operand.hbm [shape: f32[128,128], index: 5, kind: input, shape index: {}]   ;;  %s1631_s6 = inlined_call_operand.vmem [shape: f32[1,128], index: 6, kind: input, shape index: {}]   ;;  %s1632_s7 = inlined_call_operand.hbm [shape: f32[2,8,128], index: 7, kind: output, shape index: {0}]   ;;  %s1633_s8 = inlined_call_operand.hbm [shape: f32[2,8,128], index: 8, kind: output, shape index: {1}]  }
   0x1   :  { %15 = vsyncpa [#allocation6], 0 }
   0x2   :  { %16 = vsyncpa [#allocation9], 0 }
   0x3   :  { %17 = vsyncpa [#allocation4], 0 }
   0x4   :  { %18 = vsyncpa [#allocation13], 0  ;;  %s1313_s27 = smov [#allocation5]   ;;  %s1314_s29 = smov [#allocation8]  }
   0x5   :  { %s36_s28 = sshll.u32 %s1313_s27, 4  ;;  %s62_s30 = sshll.u32 %s1314_s29, 4  ;;  %s37_s28 = int_to_ptr.vmem [resolvable:$true] %s36_s28  ;;  %s63_s30 = int_to_ptr.vmem [resolvable:$true] %s62_s30 }
   0x6   :  { %s1171_s9 = scalar_lea.vmem %s37_s28, 4096  ;;  %p1176_p1 = scmp.lt.s32.totalorder %s37_s28, %s37_s28 }
   0x7   :  { %p1172_p0 = scmp.ne.s32.totalorder %s37_s28, %s1171_s9  ;;  %p1177_p2 = scmp.lt.s32.totalorder %s1171_s9, %s1171_s9 }
   0x9   :  { %p1178_p3 = por %p1177_p2, %p1176_p1 }
   0xb   :  { %p1179_p4 = pnand %p1178_p3, %p1172_p0 }
   0xd   :  { %1182 = shalt.err (!%p1179_p4)
}
   0xe   :  { %s1315_s10 = smov 128   ;;  %s1316_s11 = smov 8  }
   0xf   :  { %42 = dma.hbm_to_vmem [thread:$0]  %s1626_s1, 4096, %s37_s28, [#allocation6], %s1315_s10, %s1315_s10, %s1316_s11  }
  0x10   :  { %s1191_s14 = scalar_lea.vmem %s63_s30, 2048  ;;  %p1196_p6 = scmp.lt.s32.totalorder %s63_s30, %s63_s30 }
  0x11   :  { %p1192_p5 = scmp.ne.s32.totalorder %s63_s30, %s1191_s14  ;;  %p1197_p7 = scmp.lt.s32.totalorder %s1191_s14, %s1191_s14 }
  0x13   :  { %p1198_p8 = por %p1197_p7, %p1196_p6 }
  0x15   :  { %p1199_p9 = pnand %p1198_p8, %p1192_p5 }
  0x17   :  { %1202 = shalt.err (!%p1199_p9)
}
  0x18   :  { %68 = dma.hbm_to_vmem [thread:$0]  %s1629_s4, 2048, %s63_s30, [#allocation9], %s1315_s10, %s1315_s10, %s1316_s11  }
  0x19   :  { %s1317_s17 = smov [#allocation2]   ;;  %s1318_s19 = smov [#allocation7]  }
  0x1a   :  { %s24_s18 = sshll.u32 %s1317_s17, 4  ;;  %s48_s20 = sshll.u32 %s1318_s19, 4  ;;  %s25_s18 = int_to_ptr.vmem [resolvable:$true] %s24_s18  ;;  %s49_s20 = int_to_ptr.vmem [resolvable:$true] %s48_s20 }
  0x1b   :  { %s1211_s1 = scalar_lea.vmem %s25_s18, 256  ;;  %p1216_p11 = scmp.lt.s32.totalorder %s25_s18, %s25_s18 }
  0x1c   :  { %p1212_p10 = scmp.ne.s32.totalorder %s25_s18, %s1211_s1  ;;  %p1217_p12 = scmp.lt.s32.totalorder %s1211_s1, %s1211_s1 }
  0x1e   :  { %p1218_p13 = por %p1217_p12, %p1216_p11 }
  0x20   :  { %p1219_p0 = pnand %p1218_p13, %p1212_p10 }
  0x22   :  { %1222 = shalt.err (!%p1219_p0)
}
  0x23   :  { %30 = dma.hbm_to_vmem [thread:$0]  %s1625_s0, 256, %s25_s18, [#allocation3], %s1315_s10, %s1315_s10, %s1316_s11  }
  0x24   :  { %s1231_s4 = scalar_lea.vmem %s49_s20, 2048  ;;  %p1236_p2 = scmp.lt.s32.totalorder %s49_s20, %s49_s20 }
  0x25   :  { %p1232_p1 = scmp.ne.s32.totalorder %s49_s20, %s1231_s4  ;;  %p1237_p3 = scmp.lt.s32.totalorder %s1231_s4, %s1231_s4 }
  0x27   :  { %p1238_p4 = por %p1237_p3, %p1236_p2 }
  0x29   :  { %p1239_p5 = pnand %p1238_p4, %p1232_p1 }
  0x2b   :  { %1242 = shalt.err (!%p1239_p5)
}
  0x2c   :  { %54 = dma.hbm_to_vmem [thread:$0]  %s1627_s2, 2048, %s49_s20, [#allocation6], %s1315_s10, %s1315_s10, %s1316_s11  }
  0x2d   :  { %s1319_s25 = smov [#allocation10]  }
  0x2e   :  { %s74_s26 = sshll.u32 %s1319_s25, 4  ;;  %s75_s26 = int_to_ptr.vmem [resolvable:$true] %s74_s26 }
  0x2f   :  { %s1251_s27 = scalar_lea.vmem %s75_s26, 2048  ;;  %p1256_p7 = scmp.lt.s32.totalorder %s75_s26, %s75_s26 }
  0x30   :  { %p1252_p6 = scmp.ne.s32.totalorder %s75_s26, %s1251_s27  ;;  %p1257_p8 = scmp.lt.s32.totalorder %s1251_s27, %s1251_s27 }
  0x32   :  { %p1258_p9 = por %p1257_p8, %p1256_p7 }
  0x34   :  { %p1259_p10 = pnand %p1258_p9, %p1252_p6 }
  0x36   :  { %1262 = shalt.err (!%p1259_p10)
}
  0x37   :  { %80 = dma.hbm_to_vmem [thread:$0]  %s1630_s5, 2048, %s75_s26, [#allocation9], %s1315_s10, %s1315_s10, %s1316_s11  }
  0x38   :  { %1303 = dma.done.wait [#allocation3], 256  }
  0x39   :  { %1304 = vsyncadd [#allocation3], 4294967040 }
  0x3a   :  { %1305 = dma.done.wait [#allocation6], 6144  }
  0x3b   :  { %1306 = vsyncadd [#allocation6], 4294961152 }
  0x3c   :  { %1307 = dma.done.wait [#allocation9], 4096  }
  0x3d   :  { %1308 = vsyncadd [#allocation9], 4294963200  ;;  %v1320_v0 = vmov 0.0   ;;  %v147_v1 = vld [vmem:[#allocation7 + $0x78] sm:$0xff]  ;;  %v146_v2 = vld [vmem:[#allocation7 + $0x70] sm:$0xff]  ;;  %vm1321_vm0 = vmmov 0   ;;  %v370_v56 = vlaneseq }
  0x3e   :  { %930 = vmatprep.subr.mxu1 %v1320_v0  ;;  %895 = vmatprep.subr.mxu0 %v147_v1  ;;  %v145_v3 = vld [vmem:[#allocation7 + $0x68] sm:$0xff]  ;;  %v144_v4 = vld [vmem:[#allocation7 + $0x60] sm:$0xff]  ;;  %v98_v5 = vld [vmem:[#allocation2] sm:$0xff] }
  0x3f   :  { %896 = vmatpush3.msra.mxu0 %v147_v1  ;;  %v143_v6 = vld [vmem:[#allocation7 + $0x58] sm:$0xff]  ;;  %927 = vmatprep.mubr.f32.mxu0 %v98_v5  ;;  %v142_v8 = vld [vmem:[#allocation7 + $0x50] sm:$0xff]  ;;  %v141_v10 = vld [vmem:[#allocation7 + $0x48] sm:$0xff]  ;;  %v371_v57 = vand.u32 127, %v370_v56 }
  0x40   :  { %897 = vmatprep.subr.mxu0 %v146_v2  ;;  %v1400_v7 = vld [vmem:[#allocation5 + $0x78] sm:$0xff]  ;;  %v1404_v9 = vld [vmem:[#allocation5 + $0x70] sm:$0xff]  ;;  %v140_v11 = vld [vmem:[#allocation7 + $0x40] sm:$0xff]  ;;  %962 = vmatprep.mubr.msk.f32.mxu1 %vm1321_vm0, %v1320_v0 }
  0x41   :  { %898 = vmatpush3.msra.mxu0 %v146_v2  ;;  %931 = vmatpush3.xpose.msra.mxu1 %v1400_v7  ;;  %v1408_v12 = vld [vmem:[#allocation5 + $0x68] sm:$0xff]  ;;  %v139_v13 = vld [vmem:[#allocation7 + $0x38] sm:$0xff]  ;;  %v138_v14 = vld [vmem:[#allocation7 + $0x30] sm:$0xff]  ;;  %vm372_vm1 = vcmp.lt.s32.totalorder %v371_v57, 8 }
  0x42   :  { %899 = vmatprep.subr.mxu0 %v145_v3  ;;  %932 = vmatprep.subr.mxu1 %v1320_v0  ;;  %v1412_v15 = vld [vmem:[#allocation5 + $0x60] sm:$0xff]  ;;  %v137_v16 = vld [vmem:[#allocation7 + $0x28] sm:$0xff]  ;;  %v1416_v18 = vld [vmem:[#allocation5 + $0x58] sm:$0xff] }
  0x43   :  { %900 = vmatpush3.msra.mxu0 %v145_v3  ;;  %v136_v17 = vld [vmem:[#allocation7 + $0x20] sm:$0xff]  ;;  %v135_v19 = vld [vmem:[#allocation7 + $0x18] sm:$0xff]  ;;  %v134_v20 = vld [vmem:[#allocation7 + $0x10] sm:$0xff] }
  0x44   :  { %901 = vmatprep.subr.mxu0 %v144_v4  ;;  %v1420_v21 = vld [vmem:[#allocation5 + $0x50] sm:$0xff]  ;;  %v133_v22 = vld [vmem:[#allocation7 + $0x8] sm:$0xff]  ;;  %v132_v23 = vld [vmem:[#allocation7] sm:$0xff] }
  0x45   :  { %902 = vmatpush3.msra.mxu0 %v144_v4  ;;  %933 = vmatpush3.xpose.msra.mxu1 %v1404_v9  ;;  %v1424_v24 = vld [vmem:[#allocation5 + $0x48] sm:$0xff]  ;;  %v99_v25 = vld [vmem:[#allocation2 + $0x8] sm:$0xff]  ;;  %v1430_v27 = vld [vmem:[#allocation5 + $0x40] sm:$0xff] }
  0x46   :  { %903 = vmatprep.subr.mxu0 %v143_v6  ;;  %934 = vmatprep.subr.mxu1 %v1320_v0  ;;  %v1426_v26 = vld [vmem:[#allocation5 + $0xf8] sm:$0xff]  ;;  %v1435_v28 = vld [vmem:[#allocation5 + $0xf0] sm:$0xff]  ;;  %v1443_v30 = vld [vmem:[#allocation5 + $0xe8] sm:$0xff] }
  0x47   :  { %904 = vmatpush3.msra.mxu0 %v143_v6  ;;  %v1439_v29 = vld [vmem:[#allocation5 + $0x38] sm:$0xff]  ;;  %v1447_v31 = vld [vmem:[#allocation5 + $0x30] sm:$0xff]  ;;  %v1451_v32 = vld [vmem:[#allocation5 + $0xe0] sm:$0xff] }
  0x48   :  { %905 = vmatprep.subr.mxu0 %v142_v8  ;;  %v1455_v33 = vld [vmem:[#allocation5 + $0x28] sm:$0xff]  ;;  %v1459_v34 = vld [vmem:[#allocation5 + $0xd8] sm:$0xff]  ;;  %v1463_v35 = vld [vmem:[#allocation5 + $0x20] sm:$0xff] }
  0x49   :  { %906 = vmatpush3.msra.mxu0 %v142_v8  ;;  %935 = vmatpush3.xpose.msra.mxu1 %v1408_v12  ;;  %v1467_v36 = vld [vmem:[#allocation5 + $0xd0] sm:$0xff]  ;;  %v1471_v37 = vld [vmem:[#allocation5 + $0x18] sm:$0xff]  ;;  %v1475_v38 = vld [vmem:[#allocation5 + $0xc8] sm:$0xff] }
  0x4a   :  { %907 = vmatprep.subr.mxu0 %v141_v10  ;;  %936 = vmatprep.subr.mxu1 %v1320_v0  ;;  %v1479_v39 = vld [vmem:[#allocation5 + $0x10] sm:$0xff]  ;;  %v1483_v40 = vld [vmem:[#allocation5 + $0xc0] sm:$0xff]  ;;  %v1487_v41 = vld [vmem:[#allocation5 + $0x8] sm:$0xff] }
  0x4b   :  { %908 = vmatpush3.msra.mxu0 %v141_v10  ;;  %v1491_v42 = vld [vmem:[#allocation5 + $0xb8] sm:$0xff]  ;;  %v1497_v43 = vld [vmem:[#allocation5 + $0xb0] sm:$0xff]  ;;  %v1501_v44 = vld [vmem:[#allocation5 + $0xa8] sm:$0xff] }
  0x4c   :  { %909 = vmatprep.subr.mxu0 %v140_v11  ;;  %v1505_v45 = vld [vmem:[#allocation5 + $0xa0] sm:$0xff]  ;;  %v1509_v46 = vld [vmem:[#allocation5 + $0x98] sm:$0xff]  ;;  %v1513_v47 = vld [vmem:[#allocation5 + $0x90] sm:$0xff] }
  0x4d   :  { %910 = vmatpush3.msra.mxu0 %v140_v11  ;;  %937 = vmatpush3.xpose.msra.mxu1 %v1412_v15  ;;  %v1517_v48 = vld [vmem:[#allocation5 + $0x88] sm:$0xff]  ;;  %v1521_v49 = vld [vmem:[#allocation5 + $0x80] sm:$0xff]  ;;  %v771_v51 = vld [vmem:[%s1628_s3] ss:$0 sm:$0xff]  ;;  %s1322_s3 = smov [#allocation12]  }
  0x4e   :  { %911 = vmatprep.subr.mxu0 %v139_v13  ;;  %938 = vmatprep.subr.mxu1 %v1320_v0  ;;  %v1524_v50 = vld [vmem:[#allocation5] sm:$0xff]  ;;  %v572_v8 = vld [vmem:[#allocation10 + $0x78] sm:$0xff]  ;;  %s753_s29 = sshll.u32 %s1322_s3, 4  ;;  %s754_s29 = int_to_ptr.vmem [resolvable:$true] %s753_s29 }
  0x4f   :  { %912 = vmatpush3.msra.mxu0 %v139_v13  ;;  %s1263_s30 = scalar_lea.vmem %s754_s29, 256  ;;  %p1268_p12 = scmp.lt.s32.totalorder %s754_s29, %s754_s29 }
  0x50   :  { %913 = vmatprep.subr.mxu0 %v138_v14  ;;  %p1264_p11 = scmp.ne.s32.totalorder %s754_s29, %s1263_s30  ;;  %p1269_p13 = scmp.lt.s32.totalorder %s1263_s30, %s1263_s30 }
  0x51   :  { %914 = vmatpush3.msra.mxu0 %v138_v14  ;;  %939 = vmatpush3.xpose.msra.mxu1 %v1416_v18 }
  0x52   :  { %915 = vmatprep.subr.mxu0 %v137_v16  ;;  %940 = vmatprep.subr.mxu1 %v1320_v0  ;;  %p1270_p0 = por %p1269_p13, %p1268_p12 }
  0x53   :  { %916 = vmatpush3.msra.mxu0 %v137_v16 }
  0x54   :  { %917 = vmatprep.subr.mxu0 %v136_v17  ;;  %p1271_p1 = pnand %p1270_p0, %p1264_p11 }
  0x55   :  { %918 = vmatpush3.msra.mxu0 %v136_v17  ;;  %941 = vmatpush3.xpose.msra.mxu1 %v1420_v21 }
  0x56   :  { %919 = vmatprep.subr.mxu0 %v135_v19  ;;  %942 = vmatprep.subr.mxu1 %v1320_v0 }
  0x57   :  { %920 = vmatpush3.msra.mxu0 %v135_v19 }
  0x58   :  { %921 = vmatprep.subr.mxu0 %v134_v20 }
  0x59   :  { %922 = vmatpush3.msra.mxu0 %v134_v20  ;;  %943 = vmatpush3.xpose.msra.mxu1 %v1424_v24  ;;  %v571_v20 = vld [vmem:[#allocation10 + $0x70] sm:$0xff] }
  0x5a   :  { %923 = vmatprep.subr.mxu0 %v133_v22  ;;  %944 = vmatprep.subr.mxu1 %v1320_v0 }
  0x5b   :  { %924 = vmatpush3.msra.mxu0 %v133_v22  ;;  %v570_v22 = vld [vmem:[#allocation10 + $0x68] sm:$0xff] }
  0x5c   :  { %925 = vmatprep.subr.mxu0 %v132_v23 }
  0x5d   :  { %926 = vmatpush3.msra.mxu0 %v132_v23  ;;  %945 = vmatpush3.xpose.msra.mxu1 %v1430_v27 }
  0x5e   :  { %928 = vmatmul.mubr.f32.vlgmr.msra.gmra.mxu0 %v99_v25  ;;  %965 = vmatprep.subr.mxu0 %v1320_v0  ;;  %v555_v25 = vld [vmem:[#allocation8 + $0x70] sm:$0xff] }
  0x5f   :  { %966 = vmatpush3.xpose.msra.mxu0 %v1426_v26  ;;  %946 = vmatprep.subr.mxu1 %v1320_v0 }
  0x60   :  { %967 = vmatprep.subr.mxu0 %v1320_v0  ;;  %997 = vmatprep.mubr.msk.f32.mxu0 %vm1321_vm0, %v1320_v0 }
  0x61   :  { %947 = vmatpush3.xpose.msra.mxu1 %v1439_v29 }
  0x62   :  { %948 = vmatprep.subr.mxu1 %v1320_v0 }
  0x63   :  { %968 = vmatpush3.xpose.msra.mxu0 %v1435_v28 }
  0x64   :  { %969 = vmatprep.subr.mxu0 %v1320_v0 }
  0x65   :  { %949 = vmatpush3.xpose.msra.mxu1 %v1447_v31 }
  0x66   :  { %950 = vmatprep.subr.mxu1 %v1320_v0 }
  0x67   :  { %970 = vmatpush3.xpose.msra.mxu0 %v1443_v30 }
  0x68   :  { %971 = vmatprep.subr.mxu0 %v1320_v0 }
  0x69   :  { %951 = vmatpush3.xpose.msra.mxu1 %v1455_v33 }
  0x6a   :  { %952 = vmatprep.subr.mxu1 %v1320_v0 }
  0x6b   :  { %972 = vmatpush3.xpose.msra.mxu0 %v1451_v32 }
  0x6c   :  { %973 = vmatprep.subr.mxu0 %v1320_v0 }
  0x6d   :  { %953 = vmatpush3.xpose.msra.mxu1 %v1463_v35 }
  0x6e   :  { %954 = vmatprep.subr.mxu1 %v1320_v0 }
  0x6f   :  { %974 = vmatpush3.xpose.msra.mxu0 %v1459_v34 }
  0x70   :  { %975 = vmatprep.subr.mxu0 %v1320_v0 }
  0x71   :  { %955 = vmatpush3.xpose.msra.mxu1 %v1471_v37 }
  0x72   :  { %956 = vmatprep.subr.mxu1 %v1320_v0 }
  0x73   :  { %976 = vmatpush3.xpose.msra.mxu0 %v1467_v36 }
  0x74   :  { %977 = vmatprep.subr.mxu0 %v1320_v0 }
  0x75   :  { %957 = vmatpush3.xpose.msra.mxu1 %v1479_v39 }
  0x76   :  { %958 = vmatprep.subr.mxu1 %v1320_v0 }
  0x77   :  { %978 = vmatpush3.xpose.msra.mxu0 %v1475_v38 }
  0x78   :  { %979 = vmatprep.subr.mxu0 %v1320_v0 }
  0x79   :  { %959 = vmatpush3.xpose.msra.mxu1 %v1487_v41 }
  0x7a   :  { %960 = vmatprep.subr.mxu1 %v1320_v0 }
  0x7b   :  { %980 = vmatpush3.xpose.msra.mxu0 %v1483_v40 }
  0x7c   :  { %981 = vmatprep.subr.mxu0 %v1320_v0 }
  0x7d   :  { %961 = vmatpush3.xpose.msra.mxu1 %v1524_v50 }
  0x7e   :  { %1000 = vmatprep.subr.mxu1 %v1320_v0 }
  0x7f   :  { %982 = vmatpush3.xpose.msra.mxu0 %v1491_v42 }
  0x80   :  { %983 = vmatprep.subr.mxu0 %v1320_v0 }
  0x83   :  { %984 = vmatpush3.xpose.msra.mxu0 %v1497_v43 }
  0x84   :  { %985 = vmatprep.subr.mxu0 %v1320_v0 }
  0x87   :  { %986 = vmatpush3.xpose.msra.mxu0 %v1501_v44 }
  0x88   :  { %987 = vmatprep.subr.mxu0 %v1320_v0 }
  0x8b   :  { %988 = vmatpush3.xpose.msra.mxu0 %v1505_v45 }
  0x8c   :  { %989 = vmatprep.subr.mxu0 %v1320_v0 }
  0x8f   :  { %990 = vmatpush3.xpose.msra.mxu0 %v1509_v46 }
  0x90   :  { %991 = vmatprep.subr.mxu0 %v1320_v0 }
  0x93   :  { %992 = vmatpush3.xpose.msra.mxu0 %v1513_v47 }
  0x94   :  { %993 = vmatprep.subr.mxu0 %v1320_v0 }
  0x97   :  { %994 = vmatpush3.xpose.msra.mxu0 %v1517_v48 }
  0x98   :  { %995 = vmatprep.subr.mxu0 %v1320_v0 }
  0x9b   :  { %996 = vmatpush3.xpose.msra.mxu0 %v1521_v49 }
  0x9c   :  { %1035 = vmatprep.subr.mxu0 %v1320_v0 }
 0x11e   :  { %v929_v52 = vpop.f32.mrf.mxu0 }
 0x11f   :  { %v1536_v53 = vadd.f32 %v929_v52, %v771_v51 }
 0x120   :  { %v221_v54 = vpop.f32.mrf.mxu0 }
 0x121   :  { %v1538_v55 = vadd.f32 %v771_v51, %v221_v54  ;;  %998 = vmatmul.mubr.f32.vlgmr.msra.gmra.mxu0 %v1536_v53  ;;  %v541_v51 = vld [vmem:[#allocation8] sm:$0xff] }
 0x122   :  { %1036 = vmatpush3.msra.mxu0 %v1426_v26  ;;  %1067 = vmatprep.mubr.msk.f32.mxu0 %vm1321_vm0, %v1320_v0  ;;  %v568_v26 = vld [vmem:[#allocation10 + $0x58] sm:$0xff] }
 0x123   :  { %963 = vmatmul.mubr.f32.vlgmr.msra.gmra.mxu1 %v1538_v55  ;;  %1037 = vmatprep.subr.mxu0 %v1320_v0 }
 0x124   :  { %1001 = vmatpush3.msra.mxu1 %v1400_v7  ;;  %1038 = vmatpush3.msra.mxu0 %v1435_v28  ;;  %v567_v28 = vld [vmem:[#allocation10 + $0x50] sm:$0xff] }
 0x125   :  { %1002 = vmatprep.subr.mxu1 %v1320_v0  ;;  %1039 = vmatprep.subr.mxu0 %v1320_v0 }
 0x126   :  { %1003 = vmatpush3.msra.mxu1 %v1404_v9  ;;  %1040 = vmatpush3.msra.mxu0 %v1443_v30  ;;  %v556_v9 = vld [vmem:[#allocation8 + $0x78] sm:$0xff]  ;;  %v566_v30 = vld [vmem:[#allocation10 + $0x48] sm:$0xff] }
 0x127   :  { %1004 = vmatprep.subr.mxu1 %v1320_v0  ;;  %1041 = vmatprep.subr.mxu0 %v1320_v0 }
 0x128   :  { %1005 = vmatpush3.msra.mxu1 %v1408_v12  ;;  %1042 = vmatpush3.msra.mxu0 %v1451_v32  ;;  %v565_v32 = vld [vmem:[#allocation10 + $0x40] sm:$0xff] }
 0x129   :  { %1006 = vmatprep.subr.mxu1 %v1320_v0  ;;  %1043 = vmatprep.subr.mxu0 %v1320_v0 }
 0x12a   :  { %1007 = vmatpush3.msra.mxu1 %v1412_v15  ;;  %1044 = vmatpush3.msra.mxu0 %v1459_v34  ;;  %v564_v34 = vld [vmem:[#allocation10 + $0x38] sm:$0xff] }
 0x12b   :  { %1008 = vmatprep.subr.mxu1 %v1320_v0  ;;  %1045 = vmatprep.subr.mxu0 %v1320_v0 }
 0x12c   :  { %1009 = vmatpush3.msra.mxu1 %v1416_v18  ;;  %1046 = vmatpush3.msra.mxu0 %v1467_v36  ;;  %v563_v36 = vld [vmem:[#allocation10 + $0x30] sm:$0xff] }
 0x12d   :  { %1010 = vmatprep.subr.mxu1 %v1320_v0  ;;  %1047 = vmatprep.subr.mxu0 %v1320_v0 }
 0x12e   :  { %1011 = vmatpush3.msra.mxu1 %v1420_v21  ;;  %1048 = vmatpush3.msra.mxu0 %v1475_v38  ;;  %v562_v38 = vld [vmem:[#allocation10 + $0x28] sm:$0xff] }
 0x12f   :  { %1012 = vmatprep.subr.mxu1 %v1320_v0  ;;  %1049 = vmatprep.subr.mxu0 %v1320_v0 }
 0x130   :  { %1013 = vmatpush3.msra.mxu1 %v1424_v24  ;;  %1050 = vmatpush3.msra.mxu0 %v1483_v40  ;;  %v569_v24 = vld [vmem:[#allocation10 + $0x60] sm:$0xff] }
 0x131   :  { %1014 = vmatprep.subr.mxu1 %v1320_v0  ;;  %1051 = vmatprep.subr.mxu0 %v1320_v0  ;;  %v561_v40 = vld [vmem:[#allocation10 + $0x20] sm:$0xff] }
 0x132   :  { %1015 = vmatpush3.msra.mxu1 %v1430_v27  ;;  %1052 = vmatpush3.msra.mxu0 %v1491_v42  ;;  %v554_v27 = vld [vmem:[#allocation8 + $0x68] sm:$0xff]  ;;  %v560_v42 = vld [vmem:[#allocation10 + $0x18] sm:$0xff] }
 0x133   :  { %1016 = vmatprep.subr.mxu1 %v1320_v0  ;;  %1053 = vmatprep.subr.mxu0 %v1320_v0 }
 0x134   :  { %1017 = vmatpush3.msra.mxu1 %v1439_v29  ;;  %1054 = vmatpush3.msra.mxu0 %v1497_v43  ;;  %v553_v29 = vld [vmem:[#allocation8 + $0x60] sm:$0xff]  ;;  %v546_v43 = vld [vmem:[#allocation8 + $0x28] sm:$0xff] }
 0x135   :  { %1018 = vmatprep.subr.mxu1 %v1320_v0  ;;  %1055 = vmatprep.subr.mxu0 %v1320_v0 }
 0x136   :  { %1019 = vmatpush3.msra.mxu1 %v1447_v31  ;;  %1056 = vmatpush3.msra.mxu0 %v1501_v44  ;;  %v552_v31 = vld [vmem:[#allocation8 + $0x58] sm:$0xff]  ;;  %v559_v44 = vld [vmem:[#allocation10 + $0x10] sm:$0xff] }
 0x137   :  { %1020 = vmatprep.subr.mxu1 %v1320_v0  ;;  %1057 = vmatprep.subr.mxu0 %v1320_v0 }
 0x138   :  { %1021 = vmatpush3.msra.mxu1 %v1455_v33  ;;  %1058 = vmatpush3.msra.mxu0 %v1505_v45  ;;  %v551_v33 = vld [vmem:[#allocation8 + $0x50] sm:$0xff]  ;;  %v545_v45 = vld [vmem:[#allocation8 + $0x20] sm:$0xff] }
 0x139   :  { %1022 = vmatprep.subr.mxu1 %v1320_v0  ;;  %1059 = vmatprep.subr.mxu0 %v1320_v0 }
 0x13a   :  { %1023 = vmatpush3.msra.mxu1 %v1463_v35  ;;  %1060 = vmatpush3.msra.mxu0 %v1509_v46  ;;  %v550_v35 = vld [vmem:[#allocation8 + $0x48] sm:$0xff] }
 0x13b   :  { %1024 = vmatprep.subr.mxu1 %v1320_v0  ;;  %1061 = vmatprep.subr.mxu0 %v1320_v0  ;;  %v558_v46 = vld [vmem:[#allocation10 + $0x8] sm:$0xff] }
 0x13c   :  { %1025 = vmatpush3.msra.mxu1 %v1471_v37  ;;  %1032 = vmatprep.mubr.msk.f32.mxu1 %vm1321_vm0, %v1320_v0  ;;  %v549_v37 = vld [vmem:[#allocation8 + $0x40] sm:$0xff] }
 0x13d   :  { %1026 = vmatprep.subr.mxu1 %v1320_v0  ;;  %1062 = vmatpush3.msra.mxu0 %v1513_v47  ;;  %v544_v47 = vld [vmem:[#allocation8 + $0x18] sm:$0xff] }
 0x13e   :  { %1027 = vmatpush3.msra.mxu1 %v1479_v39  ;;  %1063 = vmatprep.subr.mxu0 %v1320_v0  ;;  %v548_v39 = vld [vmem:[#allocation8 + $0x38] sm:$0xff] }
 0x13f   :  { %1028 = vmatprep.subr.mxu1 %v1320_v0  ;;  %1064 = vmatpush3.msra.mxu0 %v1517_v48  ;;  %v557_v48 = vld [vmem:[#allocation10] sm:$0xff] }
 0x140   :  { %1029 = vmatpush3.msra.mxu1 %v1487_v41  ;;  %1065 = vmatprep.subr.mxu0 %v1320_v0  ;;  %v547_v41 = vld [vmem:[#allocation8 + $0x30] sm:$0xff] }
 0x141   :  { %1030 = vmatprep.subr.mxu1 %v1320_v0  ;;  %1066 = vmatpush3.msra.mxu0 %v1521_v49  ;;  %v543_v49 = vld [vmem:[#allocation8 + $0x10] sm:$0xff] }
 0x142   :  { %1031 = vmatpush3.msra.mxu1 %v1524_v50  ;;  %1105 = vmatprep.subr.mxu0 %v556_v9  ;;  %v542_v50 = vld [vmem:[#allocation8 + $0x8] sm:$0xff] }
 0x143   :  { %1070 = vmatprep.subr.mxu1 %v572_v8 }
 0x1e1   :  { %v366_v58 = vpop.f32.mrf.mxu0 }
 0x1e2   :  { %v374_v63 = vsel %vm372_vm1, %v366_v58, -1e+30 }
 0x1e3   :  { %v296_v59 = vpop.f32.mrf.mxu1  ;;  %v999_v60 = vpop.f32.mrf.mxu0 }
 0x1e4   :  { %v373_v61 = vsel %vm372_vm1, %v296_v59, -1e+30 }
 0x1e5   :  { %375 = vmax.xlane.f32.xlu0 %v373_v61  ;;  %v964_v62 = vpop.f32.mrf.mxu1 }
 0x1e9   :  { %377 = vmax.xlane.f32.xlu0 %v374_v63 }
 0x26e   :  { %v376_v1 = vpop.xlane.xlu0 %375 }
 0x26f   :  { %v379_v2 = vsub.f32 %v373_v61, %v376_v1 }
 0x271   :  { %v381_v3 = vmul.f32 1.442695, %v379_v2 }
 0x272   :  { %v378_v4 = vpop.xlane.xlu0 %377 }
 0x273   :  { %1151 = vpow2.f32 %v381_v3  ;;  %v380_v0 = vsub.f32 %v374_v63, %v378_v4 }
 0x275   :  { %v383_v5 = vmul.f32 1.442695, %v380_v0 }
 0x277   :  { %1153 = vpow2.f32 %v383_v5 }
 0x280   :  { %v1152_v6 = vpop.eup %1151 }
 0x281   :  { %385 = vadd.xlane.f32.xlu1 %v1152_v6 }
 0x284   :  { %v1154_v7 = vpop.eup %1153 }
 0x285   :  { %387 = vadd.xlane.f32.xlu1 %v1154_v7 }
 0x30a   :  { %v386_v10 = vpop.xlane.xlu1 %385 }
 0x30b   :  { %1155 = vrcp.f32 %v386_v10 }
 0x30e   :  { %v388_v11 = vpop.xlane.xlu1 %387 }
 0x30f   :  { %1157 = vrcp.f32 %v388_v11 }
 0x318   :  { %v1156_v12 = vpop.eup %1155 }
 0x319   :  { %v391_v13 = vmul.f32 %v1156_v12, %v386_v10 }
 0x31b   :  { %v393_v14 = vsub.f32 2.0, %v391_v13 }
 0x31c   :  { %v1158_v15 = vpop.eup %1157 }
 0x31d   :  { %v395_v16 = vmul.f32 %v1156_v12, %v393_v14  ;;  %v392_v17 = vmul.f32 %v1158_v15, %v388_v11 }
 0x31f   :  { %v397_v18 = vmul.f32 %v1152_v6, %v395_v16  ;;  %v394_v19 = vsub.f32 2.0, %v392_v17 }
 0x321   :  { %399 = vst [vmem:[#allocation12] sm:$0xff] %v397_v18  ;;  %v396_v21 = vmul.f32 %v1158_v15, %v394_v19  ;;  %1033 = vmatmul.mubr.f32.vlgmr.msra.gmra.mxu1 %v397_v18 }
 0x322   :  { %1071 = vmatpush3.msra.mxu1 %v572_v8  ;;  %1102 = vmatprep.mubr.f32.mxu1 %v1538_v55 }
 0x323   :  { %v398_v23 = vmul.f32 %v1154_v7, %v396_v21  ;;  %1072 = vmatprep.subr.mxu1 %v571_v20 }
 0x324   :  { %1073 = vmatpush3.msra.mxu1 %v571_v20 }
 0x325   :  { %400 = vst [vmem:[#allocation12 + $0x8] sm:$0xff] %v398_v23  ;;  %1074 = vmatprep.subr.mxu1 %v570_v22  ;;  %1068 = vmatmul.mubr.f32.vlgmr.msra.gmra.mxu0 %v398_v23 }
 0x326   :  { %1075 = vmatpush3.msra.mxu1 %v570_v22  ;;  %1106 = vmatpush3.msra.mxu0 %v556_v9 }
 0x327   :  { %1076 = vmatprep.subr.mxu1 %v569_v24  ;;  %1107 = vmatprep.subr.mxu0 %v555_v25 }
 0x328   :  { %1077 = vmatpush3.msra.mxu1 %v569_v24  ;;  %1108 = vmatpush3.msra.mxu0 %v555_v25 }
 0x329   :  { %1078 = vmatprep.subr.mxu1 %v568_v26  ;;  %1109 = vmatprep.subr.mxu0 %v554_v27 }
 0x32a   :  { %1079 = vmatpush3.msra.mxu1 %v568_v26  ;;  %1110 = vmatpush3.msra.mxu0 %v554_v27 }
 0x32b   :  { %1080 = vmatprep.subr.mxu1 %v567_v28  ;;  %1111 = vmatprep.subr.mxu0 %v553_v29 }
 0x32c   :  { %1081 = vmatpush3.msra.mxu1 %v567_v28  ;;  %1112 = vmatpush3.msra.mxu0 %v553_v29 }
 0x32d   :  { %1082 = vmatprep.subr.mxu1 %v566_v30  ;;  %1113 = vmatprep.subr.mxu0 %v552_v31 }
 0x32e   :  { %1083 = vmatpush3.msra.mxu1 %v566_v30  ;;  %1114 = vmatpush3.msra.mxu0 %v552_v31 }
 0x32f   :  { %1084 = vmatprep.subr.mxu1 %v565_v32  ;;  %1115 = vmatprep.subr.mxu0 %v551_v33 }
 0x330   :  { %1085 = vmatpush3.msra.mxu1 %v565_v32  ;;  %1116 = vmatpush3.msra.mxu0 %v551_v33 }
 0x331   :  { %1086 = vmatprep.subr.mxu1 %v564_v34  ;;  %1117 = vmatprep.subr.mxu0 %v550_v35 }
 0x332   :  { %1087 = vmatpush3.msra.mxu1 %v564_v34  ;;  %1118 = vmatpush3.msra.mxu0 %v550_v35 }
 0x333   :  { %1088 = vmatprep.subr.mxu1 %v563_v36  ;;  %1119 = vmatprep.subr.mxu0 %v549_v37 }
 0x334   :  { %1089 = vmatpush3.msra.mxu1 %v563_v36  ;;  %1120 = vmatpush3.msra.mxu0 %v549_v37 }
 0x335   :  { %1090 = vmatprep.subr.mxu1 %v562_v38  ;;  %1121 = vmatprep.subr.mxu0 %v548_v39 }
 0x336   :  { %1091 = vmatpush3.msra.mxu1 %v562_v38  ;;  %1122 = vmatpush3.msra.mxu0 %v548_v39 }
 0x337   :  { %1092 = vmatprep.subr.mxu1 %v561_v40  ;;  %1123 = vmatprep.subr.mxu0 %v547_v41 }
 0x338   :  { %1093 = vmatpush3.msra.mxu1 %v561_v40  ;;  %1124 = vmatpush3.msra.mxu0 %v547_v41 }
 0x339   :  { %1094 = vmatprep.subr.mxu1 %v560_v42  ;;  %1125 = vmatprep.subr.mxu0 %v546_v43 }
 0x33a   :  { %1095 = vmatpush3.msra.mxu1 %v560_v42  ;;  %1126 = vmatpush3.msra.mxu0 %v546_v43 }
 0x33b   :  { %1096 = vmatprep.subr.mxu1 %v559_v44  ;;  %1127 = vmatprep.subr.mxu0 %v545_v45 }
 0x33c   :  { %1097 = vmatpush3.msra.mxu1 %v559_v44  ;;  %1128 = vmatpush3.msra.mxu0 %v545_v45 }
 0x33d   :  { %1098 = vmatprep.subr.mxu1 %v558_v46  ;;  %1129 = vmatprep.subr.mxu0 %v544_v47 }
 0x33e   :  { %1099 = vmatpush3.msra.mxu1 %v558_v46  ;;  %1130 = vmatpush3.msra.mxu0 %v544_v47 }
 0x33f   :  { %1100 = vmatprep.subr.mxu1 %v557_v48  ;;  %1131 = vmatprep.subr.mxu0 %v543_v49 }
 0x340   :  { %1101 = vmatpush3.msra.mxu1 %v557_v48  ;;  %1132 = vmatpush3.msra.mxu0 %v543_v49 }
 0x341   :  { %1103 = vmatmul.mubr.f32.vlgmr.msra.gmra.mxu1 %v1536_v53  ;;  %1133 = vmatprep.subr.mxu0 %v542_v50 }
 0x342   :  { %1134 = vmatpush3.msra.mxu0 %v542_v50 }
 0x343   :  { %1135 = vmatprep.subr.mxu0 %v541_v51 }
 0x344   :  { %1136 = vmatpush3.msra.mxu0 %v541_v51 }
 0x3e1   :  { %v467_v52 = vpop.f32.mrf.mxu1 }
 0x3e2   :  { %1137 = vmatprep.mubr.f32.mxu0 %v467_v52 }
 0x3e3   :  { %v1034_v54 = vpop.f32.mrf.mxu1 }
 0x3e5   :  { %v537_v55 = vpop.f32.mrf.mxu0 }
 0x3e6   :  { %1138 = vmatmul.mubr.f32.vlgmr.msra.gmra.mxu0 %v537_v55 }
 0x3e7   :  { %v1069_v56 = vpop.f32.mrf.mxu0 }
 0x3e8   :  { %1274 = shalt.err (!%p1271_p1)
}
 0x3e9   :  { %759 = dma.vmem_to_hbm [thread:$0]  %s754_s29, 256, %s1633_s8, [#allocation13], %s1315_s10, %s1315_s10, %s1316_s11  }
 0x3ea   :  { %v772_v58 = vld [vmem:[%s1631_s6] ss:$0 sm:$0xff]  ;;  %s1323_s15 = smov [#allocation11]  }
 0x3eb   :  { %s741_s16 = sshll.u32 %s1323_s15, 4  ;;  %s742_s16 = int_to_ptr.vmem [resolvable:$true] %s741_s16 }
 0x3ec   :  { %s1283_s8 = scalar_lea.vmem %s742_s16, 256  ;;  %p1288_p3 = scmp.lt.s32.totalorder %s742_s16, %s742_s16 }
 0x3ed   :  { %p1284_p2 = scmp.ne.s32.totalorder %s742_s16, %s1283_s8  ;;  %p1289_p4 = scmp.lt.s32.totalorder %s1283_s8, %s1283_s8 }
 0x3ef   :  { %p1290_p5 = por %p1289_p4, %p1288_p3 }
 0x3f1   :  { %p1291_p6 = pnand %p1290_p5, %p1284_p2 }
 0x401   :  { %v1104_v53 = vpop.f32.mrf.mxu1 }
 0x403   :  { %v639_v60 = vpop.f32.mrf.mxu1 }
 0x4a6   :  { %v1139_v57 = vpop.f32.mrf.mxu0 }
 0x4a7   :  { %v720_v59 = vadd.f32 %v1139_v57, %v1104_v53 }
 0x4a8   :  { %v714_v61 = vpop.f32.mrf.mxu0 }
 0x4a9   :  { %v731_v62 = vadd.f32 %v772_v58, %v720_v59  ;;  %v715_v63 = vadd.f32 %v714_v61, %v639_v60 }
 0x4ab   :  { %1159 = vtanh.f32 %v731_v62  ;;  %v730_v1 = vadd.f32 %v772_v58, %v715_v63 }
 0x4ad   :  { %1161 = vtanh.f32 %v730_v1 }
 0x4b8   :  { %v1160_v2 = vpop.eup %1159 }
 0x4b9   :  { %735 = vst [vmem:[#allocation11 + $0x8] sm:$0xff] %v1160_v2 }
 0x4ba   :  { %v1162_v3 = vpop.eup %1161 }
 0x4bb   :  { %734 = vst [vmem:[#allocation11] sm:$0xff] %v1162_v3 }
 0x4bc   :  { %1294 = shalt.err (!%p1291_p6)
}
 0x4bd   :  { %747 = dma.vmem_to_hbm [thread:$0]  %s742_s16, 256, %s1632_s7, [#allocation4], %s1315_s10, %s1315_s10, %s1316_s11  }
 0x4be   :  { %1309 = dma.done.wait [#allocation4], 256  }
 0x4bf   :  { %1310 = vsyncadd [#allocation4], 4294967040 }
 0x4c0   :  { %1311 = dma.done.wait [#allocation13], 256  }
 0x4c1   :  { %1312 = vsyncadd [#allocation13], 4294967040 }
 0x4c2   :  { %766 = vsyncpa [#allocation3], 1 }
 0x4c3   :  { %767 = vsyncpa [#allocation6], 1 }
 0x4c4   :  { %768 = vsyncpa [#allocation9], 1 }
 0x4c5   :  { %769 = vsyncpa [#allocation4], 1 }
 0x4c6   :  { %770 = vsyncpa [#allocation13], 1 }

</bundles_post_ra>
